<compile_context>
chip_gen: v5e
topology: v5e:2x2
jax: 0.10.0
libtpu: 0.0.40
codegen_flags: <defaults>
</compile_context>

<pallas_src>
import functools

import jax
import jax.numpy as jnp
from jax.experimental import pallas as pl
from jax.experimental.pallas import tpu as pltpu


def _leaky_softplus_kernel(x_ref, o_ref, *, alpha, one_minus_alpha):
    x = x_ref[...]
    # numerically stable softplus: log1p(exp(-|x|)) + max(x, 0)
    softplus = jnp.log1p(jnp.exp(-jnp.abs(x))) + jnp.maximum(x, 0.0)
    o_ref[...] = (alpha * x + one_minus_alpha * softplus).astype(o_ref.dtype)


def leaky_softplus(x: jax.Array, alpha: float = 0.1,
                   *, target_block_bytes: int = 2 * 1024 * 1024) -> jax.Array:
    orig_shape = x.shape
    dtype = x.dtype
    total = x.size
    lanes = 128
    itemsize = jnp.dtype(dtype).itemsize
    # dtype-aware sublane multiple: 8 for f32, 16 for bf16, 32 for int8/fp8
    sublane = max(8, 32 // itemsize)

    # Flatten to a lane-dense 2-D view. Only pad if the flat size is not a
    # multiple of 128 (tiny pad; not hit by the demo shape).
    x_flat = jnp.reshape(x, (-1,))
    rem = total % lanes
    if rem:
        x_flat = jnp.pad(x_flat, (0, lanes - rem))
    padded = x_flat.size
    rows = padded // lanes
    x2d = jnp.reshape(x_flat, (rows, lanes))

    # Pick block_rows targeting ~target_block_bytes per block (multiple of the
    # dtype sublane packing). Large inputs automatically get a multi-step grid
    # (so v7x's 2 TCs both work); small inputs collapse to a single full-extent
    # block, which is always a legal block shape.
    target_rows = (target_block_bytes // (lanes * itemsize)) // sublane * sublane
    target_rows = max(sublane, target_rows)
    block_rows = rows if target_rows >= rows else target_rows

    grid = (pl.cdiv(rows, block_rows),)

    kernel = functools.partial(
        _leaky_softplus_kernel,
        alpha=float(alpha),
        one_minus_alpha=float(1.0 - alpha),
    )

    out2d = pl.pallas_call(
        kernel,
        out_shape=jax.ShapeDtypeStruct((rows, lanes), dtype),
        grid=grid,
        in_specs=[pl.BlockSpec((block_rows, lanes), lambda i: (i, 0))],
        out_specs=pl.BlockSpec((block_rows, lanes), lambda i: (i, 0)),
        compiler_params=pltpu.CompilerParams(
            dimension_semantics=("parallel",),
        ),
        cost_estimate=pl.CostEstimate(
            flops=6 * padded,              # abs/neg/add/max + 2 mul + add
            transcendentals=2 * padded,    # exp + log1p
            bytes_accessed=2 * padded * itemsize,
        ),
    )(x2d)

    out_flat = jnp.reshape(out2d, (-1,))
    if rem:
        out_flat = out_flat[:total]
    return jnp.reshape(out_flat, orig_shape)


def _reference(x, alpha=0.1):
    xf = x.astype(jnp.float32)
    softplus = jnp.log1p(jnp.exp(-jnp.abs(xf))) + jnp.maximum(xf, 0.0)
    return (alpha * xf + (1.0 - alpha) * softplus).astype(x.dtype)


if __name__ == "__main__":
    key = jax.random.PRNGKey(0)
    # NCHW input, same convention as the PyTorch module's typical use.
    x = jax.random.normal(key, (2, 4, 16, 16), dtype=jnp.float32)

    out = leaky_softplus(x, alpha=0.1)
    out = jax.block_until_ready(out)

    ref = _reference(x, alpha=0.1)
    assert out.shape == x.shape and out.dtype == x.dtype
    assert jnp.allclose(out, ref, atol=1e-5, rtol=1e-5)

    print("KERNEL_OK")
</pallas_src>

<mosaic_0001>
module attributes {stable_mosaic.version = 11 : i64} {
  func.func @_leaky_softplus_kernel(%arg0: i32, %arg1: memref<16x128xf32, #tpu.memory_space<vmem>>, %arg2: memref<16x128xf32, #tpu.memory_space<vmem>>) attributes {dimension_semantics = [#tpu.dimension_semantics<parallel>], iteration_bounds = array<i64: 1>, scalar_prefetch = 0 : i64, scratch_operands = 0 : i64, tpu.core_type = #tpu.core_type<tc>, window_params = [{transform_indices = @transform_0, window_bounds = array<i64: 16, 128>}, {transform_indices = @transform_1, window_bounds = array<i64: 16, 128>}]} {
    %c0 = arith.constant 0 : index
    %c0_0 = arith.constant 0 : index
    %0 = vector.load %arg1[%c0, %c0_0] : memref<16x128xf32, #tpu.memory_space<vmem>>, vector<16x128xf32>
    %1 = math.absf %0 : vector<16x128xf32>
    %cst = arith.constant 0.000000e+00 : f32
    %2 = vector.broadcast %cst : f32 to vector<16x128xf32>
    %3 = arith.subf %2, %1 : vector<16x128xf32>
    %4 = math.exp %3 : vector<16x128xf32>
    %5 = math.log1p %4 : vector<16x128xf32>
    %cst_1 = arith.constant 0.000000e+00 : f32
    %6 = vector.broadcast %cst_1 : f32 to vector<16x128xf32>
    %7 = arith.maximumf %0, %6 : vector<16x128xf32>
    %8 = arith.addf %5, %7 : vector<16x128xf32>
    %cst_2 = arith.constant 1.000000e-01 : f32
    %9 = vector.broadcast %cst_2 : f32 to vector<16x128xf32>
    %10 = arith.mulf %9, %0 : vector<16x128xf32>
    %cst_3 = arith.constant 0.899999976 : f32
    %11 = vector.broadcast %cst_3 : f32 to vector<16x128xf32>
    %12 = arith.mulf %11, %8 : vector<16x128xf32>
    %13 = arith.addf %10, %12 : vector<16x128xf32>
    %c0_4 = arith.constant 0 : index
    %c0_5 = arith.constant 0 : index
    %14 = vector.load %arg2[%c0_4, %c0_5] : memref<16x128xf32, #tpu.memory_space<vmem>>, vector<16x128xf32>
    tpu.vector_store %arg2[%c0_4, %c0_5], %13 {strides = array<i32>} : memref<16x128xf32, #tpu.memory_space<vmem>>, vector<16x128xf32>,
    return
  }
  func.func @transform_0(%arg0: i32) -> (i32, i32) {
    %c0_i32 = arith.constant 0 : i32
    %c0_i32_0 = arith.constant 0 : i32
    return %arg0, %c0_i32 : i32, i32
  }
  func.func @transform_1(%arg0: i32) -> (i32, i32) {
    %c0_i32 = arith.constant 0 : i32
    %c0_i32_0 = arith.constant 0 : i32
    return %arg0, %c0_i32 : i32, i32
  }
}

</mosaic_0001>

<bundles_post_ra>
// kernel: tpu_custom_call.1
= control target key start
LH: loop header
LB: loop body
LE: loop exit
PB: predicated region body
PF: predicated region fallthrough
CT: control target
= control target key end

     0   :  { %6 = vsyncpa [#allocation3], 0  ;;  %s174_s0 = inlined_call_operand.hbm [shape: f32[16,128], index: 0, kind: input, shape index: {}]   ;;  %s175_s1 = inlined_call_operand.hbm [shape: f32[16,128], index: 1, kind: output, shape index: {}]  }
   0x1   :  { %7 = vsyncpa [#allocation4], 0  ;;  %s12_s8 = sshll.u32 %s174_s0, 4  ;;  %s148_s9 = smov [#allocation2]   ;;  %s13_s8 = int_to_ptr.hbm [resolvable:$true] %s12_s8 }
   0x2   :  { %s14_s10 = sshll.u32 %s148_s9, 4  ;;  %s149_s11 = smov 128   ;;  %s15_s10 = int_to_ptr.vmem [resolvable:$true] %s14_s10 }
   0x3   :  { %s150_s12 = smov 8  }
   0x4   :  { %20 = dma.hbm_to_vmem [thread:$0]  %s13_s8, 256, %s15_s10, [#allocation3], %s149_s11, %s149_s11, %s150_s12  }
   0x5   :  { %144 = dma.done.wait [#allocation3], 256  }
   0x6   :  { %145 = vsyncadd [#allocation3], 4294967040  ;;  %v25_v0 = vld [vmem:[#allocation2] sm:$0xff]  ;;  %v26_v1 = vld [vmem:[#allocation2 + $0x8] sm:$0xff]  ;;  %s151_s0 = smov [#allocation5]   ;;  %s71_s16 = sshll.u32 %s175_s1, 4  ;;  %s72_s16 = int_to_ptr.hbm [resolvable:$true] %s71_s16 }
   0x7   :  { %v27_v2 = vand.u32 2147483647, %v25_v0  ;;  %v28_v3 = vand.u32 2147483647, %v26_v1  ;;  %v53_v20 = vmax.f32 %v25_v0, 0.0  ;;  %v54_v24 = vmax.f32 %v26_v1, 0.0 }
   0x8   :  { %v57_v28 = vmul.f32 0.1, %v25_v0  ;;  %v58_v31 = vmul.f32 0.1, %v26_v1  ;;  %s69_s13 = sshll.u32 %s151_s0, 4  ;;  %s70_s13 = int_to_ptr.vmem [resolvable:$true] %s69_s13 }
   0x9   :  { %v29_v4 = vsub.f32 0.0, %v27_v2  ;;  %v30_v5 = vsub.f32 0.0, %v28_v3 }
   0xb   :  { %v31_v6 = vmul.f32 1.442695, %v29_v4  ;;  %v33_v7 = vmul.f32 1.442695, %v30_v5 }
   0xd   :  { %88 = vpow2.f32 %v31_v6 }
   0xe   :  { %90 = vpow2.f32 %v33_v7 }
  0x13   :  { %v89_v8 = vpop.eup %88 }
  0x14   :  { %v91_v9 = vpop.eup %90  ;;  %v35_v10 = vadd.f32 1.0, %v89_v8  ;;  %v38_v11 = vmul.f32 -0.5, %v89_v8  ;;  %v41_v15 = vand.u32 2147483647, %v89_v8 }
  0x15   :  { %v44_v12 = vadd.f32 1.0, %v91_v9  ;;  %v47_v13 = vmul.f32 -0.5, %v91_v9  ;;  %v50_v17 = vand.u32 2147483647, %v91_v9 }
  0x16   :  { %92 = vlog2.f32 %v35_v10  ;;  %v39_v14 = vadd.f32 1.0, %v38_v11  ;;  %vm42_vm0 = vcmp.lt.f32.partialorder %v41_v15, 0.0004427343 }
  0x17   :  { %94 = vlog2.f32 %v44_v12  ;;  %v48_v16 = vadd.f32 1.0, %v47_v13  ;;  %vm51_vm1 = vcmp.lt.f32.partialorder %v50_v17, 0.0004427343 }
  0x18   :  { %v40_v18 = vmul.f32 %v89_v8, %v39_v14 }
  0x19   :  { %v49_v21 = vmul.f32 %v91_v9, %v48_v16 }
  0x1c   :  { %v93_v19 = vpop.eup %92 }
  0x1d   :  { %v95_v22 = vpop.eup %94  ;;  %v37_v23 = vmul.f32 0.6931472, %v93_v19 }
  0x1e   :  { %v46_v25 = vmul.f32 0.6931472, %v95_v22 }
  0x1f   :  { %v43_v26 = vsel %vm42_vm0, %v40_v18, %v37_v23 }
  0x20   :  { %v55_v27 = vadd.f32 %v53_v20, %v43_v26  ;;  %v52_v29 = vsel %vm51_vm1, %v49_v21, %v46_v25 }
  0x21   :  { %v56_v30 = vadd.f32 %v54_v24, %v52_v29 }
  0x22   :  { %v59_v32 = vmul.f32 0.9, %v55_v27 }
  0x23   :  { %v60_v33 = vmul.f32 0.9, %v56_v30 }
  0x24   :  { %v61_v34 = vadd.f32 %v59_v32, %v57_v28 }
  0x25   :  { %v62_v35 = vadd.f32 %v60_v33, %v58_v31 }
  0x26   :  { %63 = vst [vmem:[#allocation5] sm:$0xff] %v61_v34 }
  0x27   :  { %64 = vst [vmem:[#allocation5 + $0x8] sm:$0xff] %v62_v35 }
  0x28   :  { %77 = dma.vmem_to_hbm [thread:$0]  %s70_s13, 256, %s72_s16, [#allocation4], %s149_s11, %s149_s11, %s150_s12  }
  0x29   :  { %146 = dma.done.wait [#allocation4], 256  }
  0x2a   :  { %147 = vsyncadd [#allocation4], 4294967040 }
  0x2b   :  { %82 = vsyncpa [#allocation3], 1 }
  0x2c   :  { %83 = vsyncpa [#allocation4], 1 }

</bundles_post_ra>
